<compile_context>
chip_gen: v7x
topology: tpu7x:2x2x1
jax: 0.10.0
libtpu: 0.0.40
codegen_flags: <defaults>
</compile_context>

<pallas_src>
import functools

import jax
import jax.numpy as jnp
from jax.experimental import pallas as pl
from jax.experimental.pallas import tpu as pltpu

HPAD = 128  # padded hidden / fused-head width (one full lane group)


def _round_up(x, m):
    return ((x + m - 1) // m) * m


def _choose_tm(batch, tm_max):
    """Largest tile (multiple of 8, <= tm_max) wasting <~5% padded rows."""
    cap = min(tm_max, _round_up(batch, 8))
    cands = [t for t in (2048, 1024, 512, 256, 128, 64, 32, 16, 8) if t <= cap]
    if not cands:
        return 8
    for t in cands:  # descending: first acceptable is the largest
        waste = _round_up(batch, t) - batch
        if waste <= max(int(0.05 * batch), 8):
            return t
    return cands[-1]


def _ppo_kernel(obs_ref, w1_ref, b1_ref, w2_ref, b2_ref, wh_ref, bh_ref,
                out_ref, *, n_action):
    x = obs_ref[...]                                    # [tm, obs_dim] bf16

    # Linear(obs_dim -> hidden_pad) + ReLU   (f32 accumulate, padded lanes stay 0)
    h = jnp.dot(x, w1_ref[...], preferred_element_type=jnp.float32) + b1_ref[...]
    h = jnp.maximum(h, 0.0)

    # Linear(hidden_pad -> hidden_pad) + ReLU (bf16 operands, f32 accumulate)
    h = jnp.dot(h.astype(jnp.bfloat16), w2_ref[...],
                preferred_element_type=jnp.float32) + b2_ref[...]
    h = jnp.maximum(h, 0.0)

    # Fused heads: one [tm, 128] matmul. Lane 0 = value, lanes 1..n_action = logits.
    head = jnp.dot(h.astype(jnp.bfloat16), wh_ref[...],
                   preferred_element_type=jnp.float32) + bh_ref[...]

    lane = jax.lax.broadcasted_iota(jnp.int32, head.shape, 1)
    is_logit = (lane >= 1) & (lane <= n_action)

    # Masked, max-stabilized softmax over the logit lanes only.
    # exp(-inf - m) == 0 exactly on masked lanes, so no second mask is needed.
    logits = jnp.where(is_logit, head, -jnp.inf)
    m = jnp.max(logits, axis=-1, keepdims=True)
    e = jnp.exp(logits - m)
    denom = jnp.sum(e, axis=-1, keepdims=True)
    inv = pl.reciprocal(denom, approx=True)             # EUP vrcp
    inv = inv * (2.0 - denom * inv)                     # one Newton step -> ~f32 exact
    probs = e * inv

    # Lane-dense output slab: value in lane 0, probs in logit lanes, 0 elsewhere.
    out_ref[...] = jnp.where(lane == 0, head, probs).astype(out_ref.dtype)


def ppo_forward_slab(obs, params, *, tm=1024, out_dtype=jnp.float32):
    """Run the fused kernel; returns the padded lane-dense slab [Bp, 128].

    Lane 0 = value, lanes 1..n_action = softmax probs, other lanes = 0.
    Use this form when the consumer lives in the same jit (avoids an extra
    HBM pass to materialize separate values/probs arrays).
    """
    w1, b1, w2, b2, wv, bv, wp, bp = params
    B, obs_dim = obs.shape
    hidden = w1.shape[1]
    n_action = wp.shape[1]
    assert n_action >= 1
    assert hidden <= HPAD and (1 + n_action) <= HPAD

    # --- pad + fuse weights (bf16 for the MXU); biases stay f32 ---
    bf16 = jnp.bfloat16
    w1p = jnp.zeros((obs_dim, HPAD), bf16).at[:, :hidden].set(w1.astype(bf16))
    b1p = jnp.zeros((1, HPAD), jnp.float32).at[:, :hidden].set(b1.reshape(1, -1))
    w2p = jnp.zeros((HPAD, HPAD), bf16).at[:hidden, :hidden].set(w2.astype(bf16))
    b2p = jnp.zeros((1, HPAD), jnp.float32).at[:, :hidden].set(b2.reshape(1, -1))
    whp = jnp.zeros((HPAD, HPAD), bf16)
    whp = whp.at[:hidden, 0:1].set(wv.astype(bf16))
    whp = whp.at[:hidden, 1:1 + n_action].set(wp.astype(bf16))
    bhp = jnp.zeros((1, HPAD), jnp.float32)
    bhp = bhp.at[:, 0:1].set(bv.reshape(1, -1))
    bhp = bhp.at[:, 1:1 + n_action].set(bp.reshape(1, -1))

    # --- batch tiling: large tiles (HBM-bound), multiple of 8, low pad waste.
    # tm <= 1024 keeps >= 8 grid steps once B >= 8K so v7x's 2 TCs stay busy.
    tm = _choose_tm(B, tm)
    Bp = _round_up(B, tm)
    obs_b = obs.astype(bf16)                    # halve obs DMA bytes
    obs_p = obs_b if Bp == B else jnp.pad(obs_b, ((0, Bp - B), (0, 0)))
    grid = (Bp // tm,)

    kernel = functools.partial(_ppo_kernel, n_action=n_action)
    const = lambda i: (0, 0)  # weights stay resident in VMEM across grid steps

    slab = pl.pallas_call(
        kernel,
        out_shape=jax.ShapeDtypeStruct((Bp, HPAD), out_dtype),
        grid=grid,
        in_specs=[
            pl.BlockSpec((tm, obs_dim), lambda i: (i, 0)),   # obs tile
            pl.BlockSpec((obs_dim, HPAD), const),            # w1 (bf16)
            pl.BlockSpec((1, HPAD), const),                  # b1 (f32)
            pl.BlockSpec((HPAD, HPAD), const),               # w2 (bf16)
            pl.BlockSpec((1, HPAD), const),                  # b2 (f32)
            pl.BlockSpec((HPAD, HPAD), const),               # fused head W (bf16)
            pl.BlockSpec((1, HPAD), const),                  # fused head b (f32)
        ],
        out_specs=pl.BlockSpec((tm, HPAD), lambda i: (i, 0)),
        compiler_params=pltpu.CompilerParams(
            dimension_semantics=("parallel",)),              # megacore on v7x
    )(obs_p, w1p, b1p, w2p, b2p, whp, bhp)
    return slab


def ppo_forward(obs, params, *, tm=1024, out_dtype=jnp.float32):
    """obs: [B, obs_dim] f32. Returns (values [B,1], probs [B, n_action]).

    For best perf, prefer ppo_forward_slab and slice inside the consuming jit.
    """
    n_action = params[6].shape[1]
    B = obs.shape[0]
    slab = ppo_forward_slab(obs, params, tm=tm, out_dtype=out_dtype)
    values = slab[:B, 0:1]
    probs = slab[:B, 1:1 + n_action]
    return values, probs


def init_params(key, obs_dim, n_action, hidden=64):
    """Deterministic synthetic init (uniform, roughly matching torch Linear scale)."""
    keys = jax.random.split(key, 8)

    def linear(kw, kb, fan_in, fan_out):
        bound = 1.0 / jnp.sqrt(jnp.float32(fan_in))
        w = jax.random.uniform(kw, (fan_in, fan_out), jnp.float32, -bound, bound)
        b = jax.random.uniform(kb, (1, fan_out), jnp.float32, -bound, bound)
        return w, b

    w1, b1 = linear(keys[0], keys[1], obs_dim, hidden)
    w2, b2 = linear(keys[2], keys[3], hidden, hidden)
    wv, bv = linear(keys[4], keys[5], hidden, 1)
    wp, bp = linear(keys[6], keys[7], hidden, n_action)
    return (w1, b1, w2, b2, wv, bv, wp, bp)


if __name__ == "__main__":
    OBS_DIM = 16
    N_ACTION = 8
    HIDDEN = 64
    BATCH = 8

    key = jax.random.PRNGKey(0)
    k_params, k_obs = jax.random.split(key)

    params = init_params(k_params, OBS_DIM, N_ACTION, HIDDEN)
    obs = jax.random.normal(k_obs, (BATCH, OBS_DIM), jnp.float32)

    values, probs = jax.jit(ppo_forward)(obs, params)
    jax.block_until_ready((values, probs))

    # Reference check in plain JAX f32 (matches the torch forward). Tolerances
    # are loosened because the kernel runs bf16 matmul operands on the MXU.
    w1, b1, w2, b2, wv, bv, wp, bp = params
    h = jnp.maximum(obs @ w1 + b1, 0.0)
    h = jnp.maximum(h @ w2 + b2, 0.0)
    v_ref = h @ wv + bv
    p_ref = jax.nn.softmax(h @ wp + bp, axis=-1)

    assert values.shape == (BATCH, 1)
    assert probs.shape == (BATCH, N_ACTION)
    assert jnp.allclose(values, v_ref, atol=3e-2, rtol=3e-2), (values, v_ref)
    assert jnp.allclose(probs, p_ref, atol=3e-2, rtol=3e-2), (probs, p_ref)
    assert jnp.allclose(jnp.sum(probs, axis=-1), 1.0, atol=1e-4)

    print("KERNEL_OK")
</pallas_src>

<mosaic_0001>
module attributes {stable_mosaic.version = 11 : i64} {
  func.func @_ppo_kernel(%arg0: i32, %arg1: memref<8x16xbf16, #tpu.memory_space<vmem>>, %arg2: memref<16x128xbf16, #tpu.memory_space<vmem>>, %arg3: memref<1x128xf32, #tpu.memory_space<vmem>>, %arg4: memref<128x128xbf16, #tpu.memory_space<vmem>>, %arg5: memref<1x128xf32, #tpu.memory_space<vmem>>, %arg6: memref<128x128xbf16, #tpu.memory_space<vmem>>, %arg7: memref<1x128xf32, #tpu.memory_space<vmem>>, %arg8: memref<8x128xf32, #tpu.memory_space<vmem>>) attributes {dimension_semantics = [#tpu.dimension_semantics<parallel>], iteration_bounds = array<i64: 1>, scalar_prefetch = 0 : i64, scratch_operands = 0 : i64, tpu.core_type = #tpu.core_type<tc>, window_params = [{transform_indices = @transform_0, window_bounds = array<i64: 8, 16>}, {pipeline_mode = #tpu.pipeline_mode<synchronous>, transform_indices = @transform_1, window_bounds = array<i64: 16, 128>}, {pipeline_mode = #tpu.pipeline_mode<synchronous>, transform_indices = @transform_2, window_bounds = array<i64: 1, 128>}, {pipeline_mode = #tpu.pipeline_mode<synchronous>, transform_indices = @transform_3, window_bounds = array<i64: 128, 128>}, {pipeline_mode = #tpu.pipeline_mode<synchronous>, transform_indices = @transform_4, window_bounds = array<i64: 1, 128>}, {pipeline_mode = #tpu.pipeline_mode<synchronous>, transform_indices = @transform_5, window_bounds = array<i64: 128, 128>}, {pipeline_mode = #tpu.pipeline_mode<synchronous>, transform_indices = @transform_6, window_bounds = array<i64: 1, 128>}, {transform_indices = @transform_7, window_bounds = array<i64: 8, 128>}]} {
    %c0 = arith.constant 0 : index
    %c0_0 = arith.constant 0 : index
    %0 = vector.load %arg1[%c0, %c0_0] : memref<8x16xbf16, #tpu.memory_space<vmem>>, vector<8x16xbf16>
    %c0_1 = arith.constant 0 : index
    %c0_2 = arith.constant 0 : index
    %1 = vector.load %arg2[%c0_1, %c0_2] : memref<16x128xbf16, #tpu.memory_space<vmem>>, vector<16x128xbf16>
    %cst = arith.constant dense<0.000000e+00> : vector<8x128xf32>
    %2 = tpu.matmul %0, %1, %cst {dimension_numbers = #tpu.dot_dimension_numbers<[1], [0], [0], [1], [0, 0, 1, 1], [], []>} : vector<8x16xbf16>, vector<16x128xbf16>, vector<8x128xf32> -> vector<8x128xf32>
    %c0_3 = arith.constant 0 : index
    %c0_4 = arith.constant 0 : index
    %3 = vector.load %arg3[%c0_3, %c0_4] : memref<1x128xf32, #tpu.memory_space<vmem>>, vector<1x128xf32>
    %4 = vector.broadcast %3 : vector<1x128xf32> to vector<8x128xf32>
    %5 = arith.addf %2, %4 : vector<8x128xf32>
    %cst_5 = arith.constant 0.000000e+00 : f32
    %6 = vector.broadcast %cst_5 : f32 to vector<8x128xf32>
    %7 = arith.maximumf %5, %6 : vector<8x128xf32>
    %8 = arith.truncf %7 : vector<8x128xf32> to vector<8x128xbf16>
    %c0_6 = arith.constant 0 : index
    %c0_7 = arith.constant 0 : index
    %9 = vector.load %arg4[%c0_6, %c0_7] : memref<128x128xbf16, #tpu.memory_space<vmem>>, vector<128x128xbf16>
    %cst_8 = arith.constant dense<0.000000e+00> : vector<8x128xf32>
    %10 = tpu.matmul %8, %9, %cst_8 {dimension_numbers = #tpu.dot_dimension_numbers<[1], [0], [0], [1], [0, 0, 1, 1], [], []>} : vector<8x128xbf16>, vector<128x128xbf16>, vector<8x128xf32> -> vector<8x128xf32>
    %c0_9 = arith.constant 0 : index
    %c0_10 = arith.constant 0 : index
    %11 = vector.load %arg5[%c0_9, %c0_10] : memref<1x128xf32, #tpu.memory_space<vmem>>, vector<1x128xf32>
    %12 = vector.broadcast %11 : vector<1x128xf32> to vector<8x128xf32>
    %13 = arith.addf %10, %12 : vector<8x128xf32>
    %cst_11 = arith.constant 0.000000e+00 : f32
    %14 = vector.broadcast %cst_11 : f32 to vector<8x128xf32>
    %15 = arith.maximumf %13, %14 : vector<8x128xf32>
    %16 = arith.truncf %15 : vector<8x128xf32> to vector<8x128xbf16>
    %c0_12 = arith.constant 0 : index
    %c0_13 = arith.constant 0 : index
    %17 = vector.load %arg6[%c0_12, %c0_13] : memref<128x128xbf16, #tpu.memory_space<vmem>>, vector<128x128xbf16>
    %cst_14 = arith.constant dense<0.000000e+00> : vector<8x128xf32>
    %18 = tpu.matmul %16, %17, %cst_14 {dimension_numbers = #tpu.dot_dimension_numbers<[1], [0], [0], [1], [0, 0, 1, 1], [], []>} : vector<8x128xbf16>, vector<128x128xbf16>, vector<8x128xf32> -> vector<8x128xf32>
    %c0_15 = arith.constant 0 : index
    %c0_16 = arith.constant 0 : index
    %19 = vector.load %arg7[%c0_15, %c0_16] : memref<1x128xf32, #tpu.memory_space<vmem>>, vector<1x128xf32>
    %20 = vector.broadcast %19 : vector<1x128xf32> to vector<8x128xf32>
    %21 = arith.addf %18, %20 : vector<8x128xf32>
    %22 = tpu.iota {dimensions = array<i32: 1>} : vector<8x128xi32>
    %c1_i32 = arith.constant 1 : i32
    %23 = vector.broadcast %c1_i32 : i32 to vector<8x128xi32>
    %24 = arith.cmpi sge, %22, %23 : vector<8x128xi32>
    %c8_i32 = arith.constant 8 : i32
    %25 = vector.broadcast %c8_i32 : i32 to vector<8x128xi32>
    %26 = arith.cmpi sle, %22, %25 : vector<8x128xi32>
    %27 = arith.andi %24, %26 : vector<8x128xi1>
    %cst_17 = arith.constant 0xFF800000 : f32
    %28 = vector.broadcast %cst_17 : f32 to vector<8x128xf32>
    %29 = arith.select %27, %21, %28 : vector<8x128xi1>, vector<8x128xf32>
    %cst_18 = arith.constant dense<0xFF800000> : vector<8xf32>
    %30 = vector.multi_reduction <maximumf>, %29, %cst_18 [1] : vector<8x128xf32> to vector<8xf32>
    %31 = vector.shape_cast %30 : vector<8xf32> to vector<8x1xf32>
    %32 = vector.broadcast %31 : vector<8x1xf32> to vector<8x128xf32>
    %33 = arith.subf %29, %32 : vector<8x128xf32>
    %34 = math.exp %33 : vector<8x128xf32>
    %cst_19 = arith.constant dense<0.000000e+00> : vector<8xf32>
    %35 = vector.multi_reduction <add>, %34, %cst_19 [1] : vector<8x128xf32> to vector<8xf32>
    %36 = vector.shape_cast %35 : vector<8xf32> to vector<8x1xf32>
    %37 = tpu.reciprocal %36 {approx = true} : vector<8x1xf32> -> vector<8x1xf32>
    %38 = arith.mulf %36, %37 : vector<8x1xf32>
    %cst_20 = arith.constant 2.000000e+00 : f32
    %39 = vector.broadcast %cst_20 : f32 to vector<8x1xf32>
    %40 = arith.subf %39, %38 : vector<8x1xf32>
    %41 = arith.mulf %37, %40 : vector<8x1xf32>
    %42 = vector.broadcast %41 : vector<8x1xf32> to vector<8x128xf32>
    %43 = arith.mulf %34, %42 : vector<8x128xf32>
    %c0_i32 = arith.constant 0 : i32
    %44 = vector.broadcast %c0_i32 : i32 to vector<8x128xi32>
    %45 = arith.cmpi eq, %22, %44 : vector<8x128xi32>
    %46 = arith.select %45, %21, %43 : vector<8x128xi1>, vector<8x128xf32>
    %c0_21 = arith.constant 0 : index
    %c0_22 = arith.constant 0 : index
    %47 = vector.load %arg8[%c0_21, %c0_22] : memref<8x128xf32, #tpu.memory_space<vmem>>, vector<8x128xf32>
    tpu.vector_store %arg8[%c0_21, %c0_22], %46 {strides = array<i32>} : memref<8x128xf32, #tpu.memory_space<vmem>>, vector<8x128xf32>,
    return
  }
  func.func @transform_0(%arg0: i32) -> (i32, i32) {
    %c0_i32 = arith.constant 0 : i32
    %c0_i32_0 = arith.constant 0 : i32
    return %arg0, %c0_i32 : i32, i32
  }
  func.func @transform_1(%arg0: i32) -> (i32, i32) {
    %c0_i32 = arith.constant 0 : i32
    %c0_i32_0 = arith.constant 0 : i32
    %c0_i32_1 = arith.constant 0 : i32
    return %c0_i32, %c0_i32_0 : i32, i32
  }
  func.func @transform_2(%arg0: i32) -> (i32, i32) {
    %c0_i32 = arith.constant 0 : i32
    %c0_i32_0 = arith.constant 0 : i32
    %c0_i32_1 = arith.constant 0 : i32
    return %c0_i32, %c0_i32_0 : i32, i32
  }
  func.func @transform_3(%arg0: i32) -> (i32, i32) {
    %c0_i32 = arith.constant 0 : i32
    %c0_i32_0 = arith.constant 0 : i32
    %c0_i32_1 = arith.constant 0 : i32
    return %c0_i32, %c0_i32_0 : i32, i32
  }
  func.func @transform_4(%arg0: i32) -> (i32, i32) {
    %c0_i32 = arith.constant 0 : i32
    %c0_i32_0 = arith.constant 0 : i32
    %c0_i32_1 = arith.constant 0 : i32
    return %c0_i32, %c0_i32_0 : i32, i32
  }
  func.func @transform_5(%arg0: i32) -> (i32, i32) {
    %c0_i32 = arith.constant 0 : i32
    %c0_i32_0 = arith.constant 0 : i32
    %c0_i32_1 = arith.constant 0 : i32
    return %c0_i32, %c0_i32_0 : i32, i32
  }
  func.func @transform_6(%arg0: i32) -> (i32, i32) {
    %c0_i32 = arith.constant 0 : i32
    %c0_i32_0 = arith.constant 0 : i32
    %c0_i32_1 = arith.constant 0 : i32
    return %c0_i32, %c0_i32_0 : i32, i32
  }
  func.func @transform_7(%arg0: i32) -> (i32, i32) {
    %c0_i32 = arith.constant 0 : i32
    %c0_i32_0 = arith.constant 0 : i32
    return %arg0, %c0_i32 : i32, i32
  }
}

</mosaic_0001>

<bundles_post_ra>
// kernel: ppo_forward.1
= control target key start
LH: loop header
LB: loop body
LE: loop exit
PB: predicated region body
PF: predicated region fallthrough
CT: control target
= control target key end

     0   :  { %v448_v0 = vmov 0.0   ;;  %vm449_vm0 = vmmov 0   ;;  %vm43_vm1 = vcmask 130048   ;;  %v313_v35 = vlaneseq  ;;  %s576_s1 = inlined_call_operand.vmem [shape: bf16[16,128], index: 1, kind: input, shape index: {}]   ;;  %s577_s0 = inlined_call_operand.vmem [shape: bf16[8,16], index: 0, kind: input, shape index: {}]   ;;  %s578_s3 = inlined_call_operand.vmem [shape: bf16[128,128], index: 3, kind: input, shape index: {}]   ;;  %s579_s5 = inlined_call_operand.vmem [shape: bf16[128,128], index: 5, kind: input, shape index: {}]   ;;  %s580_s2 = inlined_call_operand.vmem [shape: f32[1,128], index: 2, kind: input, shape index: {}]   ;;  %s581_s4 = inlined_call_operand.vmem [shape: f32[1,128], index: 4, kind: input, shape index: {}]   ;;  %s582_s6 = inlined_call_operand.vmem [shape: f32[1,128], index: 6, kind: input, shape index: {}]   ;;  %s583_s7 = inlined_call_operand.vmem [shape: f32[8,128], index: 7, kind: output, shape index: {}]  }
   0x1   :  { %379 = vmatprep.subr.bf16.mxu0 %v448_v0  ;;  %v427_v1 = vld [vmem:[%s576_s1] sm:$0xff]   ;;  %381 = vmatprep.mubr.msk.bf16.mxu0 %vm449_vm0, %v448_v0  ;;  %v429_v4 = vld [vmem:[%s578_s3 + $0x8] sm:$0xff]   ;;  %v430_v5 = vld [vmem:[%s578_s3 + $0x10] sm:$0xff]  }
   0x2   :  { %v27_v2 = vld [vmem:[%s577_s0] sm:$0xf]  ;;  %385 = vmatprep.subr.bf16.mxu1 %v448_v0  ;;  %401 = vmatprep.mubr.msk.bf16.mxu1 %vm449_vm0, %v448_v0  ;;  %v431_v6 = vld [vmem:[%s578_s3 + $0x18] sm:$0xff]   ;;  %v433_v8 = vld [vmem:[%s578_s3 + $0x28] sm:$0xff]   ;;  %v314_v36 = vand.u32 127, %v313_v35 }
   0x3   :  { %380 = vmatpush3.bf16.msra.mxu0 %v427_v1  ;;  %v428_v3 = vld [vmem:[%s578_s3] sm:$0xff]   ;;  %v434_v9 = vld [vmem:[%s578_s3 + $0x30] sm:$0xff]   ;;  %v435_v10 = vld [vmem:[%s578_s3 + $0x38] sm:$0xff]  }
   0x4   :  { %405 = vmatprep.subr.bf16.mxu0 %v448_v0  ;;  %386 = vmatpush3.bf16.msra.mxu1 %v428_v3  ;;  %v432_v7 = vld [vmem:[%s578_s3 + $0x20] sm:$0xff]   ;;  %v437_v12 = vld [vmem:[%s579_s5 + $0x8] sm:$0xff]   ;;  %v438_v13 = vld [vmem:[%s579_s5 + $0x10] sm:$0xff]   ;;  %vm315_vm2 = vcmp.ge.s32.totalorder %v314_v36, 1  ;;  %vm316_vm3 = vcmp.le.s32.totalorder %v314_v36, 8  ;;  %vm331_vm5 = vcmp.eq.s32.totalorder %v314_v36, 0 }
   0x5   :  { %387 = vmatprep.subr.bf16.mxu1 %v448_v0  ;;  %v436_v11 = vld [vmem:[%s579_s5] sm:$0xff]   ;;  %v439_v14 = vld [vmem:[%s579_s5 + $0x18] sm:$0xff]   ;;  %v441_v16 = vld [vmem:[%s579_s5 + $0x28] sm:$0xff]  }
   0x6   :  { %382 = vmatmul.mubr.msk.bf16.vlgmr.msra.gmra.mrb[0].mxu0 %vm43_vm1, %v27_v2  ;;  %v440_v15 = vld [vmem:[%s579_s5 + $0x20] sm:$0xff]   ;;  %v442_v25 = vld [vmem:[%s579_s5 + $0x30] sm:$0xff]   ;;  %v443_v26 = vld [vmem:[%s579_s5 + $0x38] sm:$0xff]  }
   0x7   :  { %421 = vmatprep.mubr.msk.bf16.mxu0 %vm449_vm0, %v448_v0  ;;  %406 = vmatpush3.bf16.msra.mxu0 %v436_v11  ;;  %v338_v17 = vld [vmem:[%s580_s2] ss:$0 sm:$0xff]  ;;  %vm317_vm4 = vmand %vm315_vm2, %vm316_vm3 }
   0x8   :  { %388 = vmatpush3.bf16.msra.mxu1 %v429_v4  ;;  %407 = vmatprep.subr.bf16.mxu0 %v448_v0  ;;  %v341_v27 = vld [vmem:[%s581_s4] ss:$0 sm:$0xff] }
   0x9   :  { %389 = vmatprep.subr.bf16.mxu1 %v448_v0  ;;  %v350_v37 = vld [vmem:[%s582_s6] ss:$0 sm:$0xff] }
   0xb   :  { %408 = vmatpush3.bf16.msra.mxu0 %v437_v12 }
   0xc   :  { %390 = vmatpush3.bf16.msra.mxu1 %v430_v5  ;;  %409 = vmatprep.subr.bf16.mxu0 %v448_v0 }
   0xd   :  { %391 = vmatprep.subr.bf16.mxu1 %v448_v0 }
   0xf   :  { %410 = vmatpush3.bf16.msra.mxu0 %v438_v13 }
  0x10   :  { %392 = vmatpush3.bf16.msra.mxu1 %v431_v6  ;;  %411 = vmatprep.subr.bf16.mxu0 %v448_v0 }
  0x11   :  { %393 = vmatprep.subr.bf16.mxu1 %v448_v0 }
  0x13   :  { %412 = vmatpush3.bf16.msra.mxu0 %v439_v14 }
  0x14   :  { %394 = vmatpush3.bf16.msra.mxu1 %v432_v7  ;;  %413 = vmatprep.subr.bf16.mxu0 %v448_v0 }
  0x15   :  { %395 = vmatprep.subr.bf16.mxu1 %v448_v0 }
  0x17   :  { %414 = vmatpush3.bf16.msra.mxu0 %v440_v15 }
  0x18   :  { %396 = vmatpush3.bf16.msra.mxu1 %v433_v8  ;;  %415 = vmatprep.subr.bf16.mxu0 %v448_v0 }
  0x19   :  { %397 = vmatprep.subr.bf16.mxu1 %v448_v0 }
  0x1b   :  { %416 = vmatpush3.bf16.msra.mxu0 %v441_v16 }
  0x1c   :  { %398 = vmatpush3.bf16.msra.mxu1 %v434_v9  ;;  %417 = vmatprep.subr.bf16.mxu0 %v448_v0 }
  0x1d   :  { %399 = vmatprep.subr.bf16.mxu1 %v448_v0 }
  0x1f   :  { %418 = vmatpush3.bf16.msra.mxu0 %v442_v25 }
  0x20   :  { %400 = vmatpush3.bf16.msra.mxu1 %v435_v10  ;;  %419 = vmatprep.subr.bf16.mxu0 %v448_v0 }
  0x23   :  { %420 = vmatpush3.bf16.msra.mxu0 %v443_v26 }
  0xd9   :  { %v81_v18 = vpop.f32.mrb[0].mxu0 }
  0xda   :  { %v82_v19 = vadd.f32 %v338_v17, %v81_v18  ;;  %v383_v20 = vpop.f32.mrb[1].mxu0 }
  0xdb   :  { %v84_v21 = vpop.f32.mrb[2].mxu0 }
  0xdc   :  { %v87_v22 = vmax.f32 %v82_v19, 0.0  ;;  %v384_v23 = vpop.f32.mrb[3].mxu0 }
  0xde   :  { %v88_v24 = vpack.c.bf16 %v87_v22, %v87_v22 }
  0xe0   :  { %402 = vmatmul.mubr.bf16.vlgmr.msra.gmra.mrb[0].mxu1 %v88_v24 }
 0x1b3   :  { %v194_v28 = vpop.f32.mrb[0].mxu1 }
 0x1b4   :  { %v195_v29 = vadd.f32 %v341_v27, %v194_v28  ;;  %v403_v30 = vpop.f32.mrb[1].mxu1 }
 0x1b5   :  { %v197_v31 = vpop.f32.mrb[2].mxu1 }
 0x1b6   :  { %v200_v32 = vmax.f32 %v195_v29, 0.0  ;;  %v404_v33 = vpop.f32.mrb[3].mxu1 }
 0x1b8   :  { %v201_v34 = vpack.c.bf16 %v200_v32, %v200_v32 }
 0x1ba   :  { %422 = vmatmul.mubr.bf16.vlgmr.msra.gmra.mrb[4].mxu0 %v201_v34 }
 0x28d   :  { %v307_v38 = vpop.f32.mrb[4].mxu0 }
 0x28e   :  { %v308_v39 = vadd.f32 %v350_v37, %v307_v38  ;;  %v423_v40 = vpop.f32.mrb[5].mxu0 }
 0x28f   :  { %v310_v41 = vpop.f32.mrb[6].mxu0 }
 0x290   :  { %v424_v42 = vpop.f32.mrb[7].mxu0  ;;  %v318_v43 = vsel %vm317_vm4, %v308_v39, -inf }
 0x291   :  { %319 = vmax.xlane.f32.xlu0 %v318_v43 }
 0x31e   :  { %v320_v44 = vpop.xlane.xlu0 %319 }
 0x31f   :  { %v321_v45 = vsub.f32 %v318_v43, %v320_v44 }
 0x321   :  { %v322_v46 = vmul.f32 1.442695, %v321_v45 }
 0x323   :  { %444 = vpow2.f32 %v322_v46 }
 0x32d   :  { %v445_v47 = vpop.eup %444 }
 0x32e   :  { %324 = vadd.xlane.f32.xlu0 %v445_v47 }
 0x3bb   :  { %v325_v48 = vpop.xlane.xlu0 %324 }
 0x3bc   :  { %446 = vrcp.f32 %v325_v48 }
 0x3c6   :  { %v447_v49 = vpop.eup %446 }
 0x3c7   :  { %v327_v50 = vmul.f32 %v447_v49, %v325_v48 }
 0x3c9   :  { %v328_v51 = vsub.f32 2.0, %v327_v50 }
 0x3cb   :  { %v329_v52 = vmul.f32 %v447_v49, %v328_v51 }
 0x3cd   :  { %v330_v53 = vmul.f32 %v445_v47, %v329_v52 }
 0x3cf   :  { %v332_v54 = vsel %vm331_vm5, %v308_v39, %v330_v53 }
 0x3d0   :  { %333 = vst [vmem:[%s583_s7] sm:$0xff] %v332_v54 }

</bundles_post_ra>
